<compile_context>
chip_gen: v6e
topology: v6e:2x2x1
jax: 0.10.0
libtpu: 0.0.40
codegen_flags: <defaults>
</compile_context>

<pallas_src>
import functools

import jax
import jax.numpy as jnp
from jax.experimental import pallas as pl
from jax.experimental.pallas import tpu as pltpu


# Row layout of the fused vector-parameter block (shape (_N_VEC, D)).
_DW, _G1, _B1, _BR, _BV, _G2, _B2 = range(7)
_N_VEC = 7


def _layer_norm(h, gamma, beta, eps=1e-5):
    mean = jnp.mean(h, axis=-1, keepdims=True)
    cent = h - mean
    var = jnp.mean(cent * cent, axis=-1, keepdims=True)
    return cent * jax.lax.rsqrt(var + eps) * gamma + beta


def _attention_stream_kernel(
    scalars_ref,        # SMEM (2,): [mu, decay_bias]
    x_ref, xprev_ref,   # VMEM (Bb, T, D)  -- native lane width D (no padding)
    vec_ref,            # VMEM (7, D): [dw, ln1_g, ln1_b, br, bv, ln2_g, ln2_b]
    wrv_ref,            # VMEM (D, 2*Dp): [Wr | 0 | Wv | 0] (column-padded halves)
    out_ref,            # VMEM (Bb, T, D)
    a_scr,              # VMEM (Bb, T, 1) scratch: per-step denominators
    b_scr,              # VMEM (Bb, T, D) scratch: per-step numerators
):
    bb, T, D = x_ref.shape
    Dp = wrv_ref.shape[1] // 2

    mu = scalars_ref[0]
    decay_b = scalars_ref[1]

    vecs = vec_ref[...]                                   # (7, D)
    dw = vecs[_DW:_DW + 1, :]                             # (1, D)
    g1 = vecs[_G1:_G1 + 1, :]
    be1 = vecs[_B1:_B1 + 1, :]
    br = vecs[_BR:_BR + 1, :]
    bv = vecs[_BV:_BV + 1, :]
    g2 = vecs[_G2:_G2 + 1, :]
    be2 = vecs[_B2:_B2 + 1, :]

    # ---- Shift -------------------------------------------------------------
    shifted = mu * x_ref[...] + (1.0 - mu) * xprev_ref[...]        # (Bb, T, D)

    # ---- SequenceMergingSeq (C = V = W = shifted) ----------------------------
    # decay_t = sigmoid(<W_t, dw> + db): VPU multiply + XLU lane reduction
    decay_all = jax.nn.sigmoid(
        jnp.sum(shifted * dw, axis=2, keepdims=True) + decay_b)    # (Bb, T, 1)
    exp_c = jnp.exp(shifted)                                       # (Bb, T, D)
    s_all = jnp.sum(exp_c, axis=2, keepdims=True)                  # (Bb, T, 1)
    ev_all = exp_c * shifted                                       # (Bb, T, D)

    # Sequential recurrence: carry only (a, b) in registers; stage per-step
    # states to VMEM scratch, normalize with one batched reciprocal afterwards.
    # TODO(synk): for large T switch to lax.fori_loop + pl.ds(t, 1) writes.
    a = jnp.zeros((bb, 1), jnp.float32)
    b = jnp.zeros((bb, D), jnp.float32)
    for t in range(T):                        # T small & static -> unrolled
        d_t = decay_all[:, t, :]              # (Bb, 1)
        a = d_t * a + s_all[:, t, :]
        b = d_t * b + ev_all[:, t, :]
        a_scr[:, t, :] = a
        b_scr[:, t, :] = b

    a_all = a_scr[...].reshape(bb * T, 1)
    b_all = b_scr[...].reshape(bb * T, D)
    merged = b_all * (1.0 / (a_all + 1e-8))                        # (Bb*T, D)
    merged = _layer_norm(merged, g1, be1)

    # ---- StateCoupling: single fused [Wr | Wv] matmul -------------------------
    logits = jnp.dot(merged, wrv_ref[...],
                     preferred_element_type=jnp.float32)           # (Bb*T, 2*Dp)
    gate = jax.nn.sigmoid(logits[:, :D] + br)                      # (Bb*T, D)
    value = logits[:, Dp:Dp + D] + bv                              # (Bb*T, D)
    coupled = _layer_norm(gate * value, g2, be2)                   # (Bb*T, D)

    out_ref[...] = (shifted + coupled.reshape(bb, T, D)).astype(out_ref.dtype)


def _num_tensorcores():
    """TensorCores addressable by one pallas_call (v7x megacore = 2)."""
    try:
        kind = jax.devices()[0].device_kind.lower()
    except Exception:
        return 1
    return 2 if "7" in kind else 1


def _pick_block_b(B, T, target_rows=2048):
    """Largest batch block with ~target_rows rows per program (stays under the
    default scoped-VMEM limit on all generations), keeping the grid shardable
    across TensorCores when the chip has more than one."""
    ncores = _num_tensorcores()
    target_bb = max(1, min(B, target_rows // max(T, 1)))
    divisors = [bb for bb in range(1, B + 1) if B % bb == 0]
    cands = [bb for bb in divisors if bb <= target_bb] or [min(divisors)]
    if ncores > 1:
        multi = [bb for bb in cands if (B // bb) % ncores == 0]
        if multi:
            return max(multi)
    return max(cands)


def attention_stream_block(x, x_prev, params, *, block_b=None):
    """x, x_prev: (B, T, D) float32.  If x_prev is None, Shift returns x."""
    if x_prev is None:
        x_prev = x  # mu*x + (1-mu)*x == x

    B, T, D = x.shape
    Dp = 128 * pl.cdiv(D, 128)     # lane-aligned column width per matmul half
    if block_b is None:
        block_b = _pick_block_b(B, T)
    assert B % block_b == 0

    xf = x.astype(jnp.float32)
    xpf = x_prev.astype(jnp.float32)

    scalars = jnp.stack(
        [jnp.asarray(params["mu"], jnp.float32).reshape(()),
         jnp.asarray(params["decay_b"], jnp.float32).reshape(())])        # (2,)

    # Fused vector params: one (7, D) block, one DMA.
    vecs = jnp.stack([
        params["decay_w"].reshape(D),
        params["ln1_gamma"].reshape(D),
        params["ln1_beta"].reshape(D),
        params["wr_b"].reshape(D),
        params["wv_b"].reshape(D),
        params["ln2_gamma"].reshape(D),
        params["ln2_beta"].reshape(D),
    ]).astype(jnp.float32)                                                 # (7, D)

    # Fused matmul weight: [Wr | 0 | Wv | 0] -> (D, 2*Dp), halves lane-aligned.
    pad_cols = Dp - D
    wr = jnp.pad(params["wr_w"].astype(jnp.float32), ((0, 0), (0, pad_cols)))
    wv = jnp.pad(params["wv_w"].astype(jnp.float32), ((0, 0), (0, pad_cols)))
    wrv = jnp.concatenate([wr, wv], axis=1)                                # (D, 2Dp)

    batch_map = lambda i: (i, 0, 0)
    const_map = lambda i: (0, 0)

    out = pl.pallas_call(
        _attention_stream_kernel,
        out_shape=jax.ShapeDtypeStruct((B, T, D), jnp.float32),
        grid_spec=pltpu.PrefetchScalarGridSpec(
            num_scalar_prefetch=0,
            grid=(B // block_b,),
            in_specs=[
                pl.BlockSpec(memory_space=pltpu.MemorySpace.SMEM),  # [mu, decay_b]
                pl.BlockSpec((block_b, T, D), batch_map),           # x
                pl.BlockSpec((block_b, T, D), batch_map),           # x_prev
                pl.BlockSpec((_N_VEC, D), const_map),               # fused vec params
                pl.BlockSpec((D, 2 * Dp), const_map),               # [Wr | Wv]
            ],
            out_specs=pl.BlockSpec((block_b, T, D), batch_map),
            scratch_shapes=[
                pltpu.VMEM((block_b, T, 1), jnp.float32),           # a carry trace
                pltpu.VMEM((block_b, T, D), jnp.float32),           # b carry trace
            ],
        ),
        compiler_params=pltpu.CompilerParams(
            dimension_semantics=("parallel",),
        ),
    )(scalars, xf, xpf, vecs, wrv)

    return out


def reference_jax(x, x_prev, params):
    """Pure-JAX reference mirroring the PyTorch forward."""
    if x_prev is None:
        x_prev = x
    mu = params["mu"]
    shifted = mu * x + (1.0 - mu) * x_prev
    B, T, D = shifted.shape

    dw, db = params["decay_w"], params["decay_b"]
    a = jnp.zeros((B, 1), jnp.float32)
    b = jnp.zeros((B, D), jnp.float32)
    outs = []
    for t in range(T):
        c_t = shifted[:, t, :]
        decay = jax.nn.sigmoid(c_t @ dw + db)               # (B, 1)
        a = decay * a + jnp.exp(c_t).sum(axis=1, keepdims=True)
        b = decay * b + jnp.exp(c_t) * c_t
        outs.append(b / (a + 1e-8))
    merged = jnp.stack(outs, axis=1)                        # (B, T, D)

    def ln(h, g, be, eps=1e-5):
        m = h.mean(-1, keepdims=True)
        v = ((h - m) ** 2).mean(-1, keepdims=True)
        return (h - m) / jnp.sqrt(v + eps) * g + be

    merged = ln(merged, params["ln1_gamma"], params["ln1_beta"])
    gate = jax.nn.sigmoid(merged @ params["wr_w"] + params["wr_b"])
    value = merged @ params["wv_w"] + params["wv_b"]
    coupled = ln(gate * value, params["ln2_gamma"], params["ln2_beta"])
    return shifted + coupled


def init_params(key, D):
    ks = jax.random.split(key, 6)
    scale = 0.1
    return {
        "mu": jnp.array(0.5, jnp.float32),
        "decay_w": scale * jax.random.normal(ks[0], (D, 1), jnp.float32),
        "decay_b": scale * jax.random.normal(ks[1], (1,), jnp.float32),
        "ln1_gamma": jnp.ones((D,), jnp.float32),
        "ln1_beta": jnp.zeros((D,), jnp.float32),
        "wr_w": scale * jax.random.normal(ks[2], (D, D), jnp.float32),
        "wr_b": scale * jax.random.normal(ks[3], (D,), jnp.float32),
        "wv_w": scale * jax.random.normal(ks[4], (D, D), jnp.float32),
        "wv_b": scale * jax.random.normal(ks[5], (D,), jnp.float32),
        "ln2_gamma": jnp.ones((D,), jnp.float32),
        "ln2_beta": jnp.zeros((D,), jnp.float32),
    }


if __name__ == "__main__":
    B, T, D = 2, 8, 80  # embedding_dim = 80 per module definition

    key = jax.random.PRNGKey(0)
    k_x, k_xp, k_p = jax.random.split(key, 3)
    x = jax.random.normal(k_x, (B, T, D), jnp.float32)
    x_prev = jax.random.normal(k_xp, (B, T, D), jnp.float32)
    params = init_params(k_p, D)

    out = attention_stream_block(x, x_prev, params)
    out = jax.block_until_ready(out)

    ref = reference_jax(x, x_prev, params)
    assert out.shape == (B, T, D)
    err = float(jnp.max(jnp.abs(out - ref)))
    assert jnp.allclose(out, ref, atol=1e-4, rtol=1e-4), err
    print("KERNEL_OK")
</pallas_src>

<mosaic_0001>
module attributes {stable_mosaic.version = 11 : i64} {
  func.func @_attention_stream_kernel(%arg0: i32, %arg1: memref<2xf32, #tpu.memory_space<smem>>, %arg2: memref<2x8x80xf32, #tpu.memory_space<vmem>>, %arg3: memref<2x8x80xf32, #tpu.memory_space<vmem>>, %arg4: memref<7x80xf32, #tpu.memory_space<vmem>>, %arg5: memref<80x256xf32, #tpu.memory_space<vmem>>, %arg6: memref<2x8x80xf32, #tpu.memory_space<vmem>>, %arg7: memref<2x8x1xf32, #tpu.memory_space<vmem>>, %arg8: memref<2x8x80xf32, #tpu.memory_space<vmem>>) attributes {dimension_semantics = [#tpu.dimension_semantics<parallel>], iteration_bounds = array<i64: 1>, scalar_prefetch = 0 : i64, scratch_operands = 2 : i64, tpu.core_type = #tpu.core_type<tc>, window_params = [{transform_indices = @transform_0, window_bounds = array<i64: 2>}, {transform_indices = @transform_1, window_bounds = array<i64: 2, 8, 80>}, {transform_indices = @transform_2, window_bounds = array<i64: 2, 8, 80>}, {pipeline_mode = #tpu.pipeline_mode<synchronous>, transform_indices = @transform_3, window_bounds = array<i64: 7, 80>}, {pipeline_mode = #tpu.pipeline_mode<synchronous>, transform_indices = @transform_4, window_bounds = array<i64: 80, 256>}, {transform_indices = @transform_5, window_bounds = array<i64: 2, 8, 80>}]} {
    %c0 = arith.constant 0 : index
    %0 = memref.load %arg1[%c0] : memref<2xf32, #tpu.memory_space<smem>>
    %c1 = arith.constant 1 : index
    %1 = memref.load %arg1[%c1] : memref<2xf32, #tpu.memory_space<smem>>
    %c0_0 = arith.constant 0 : index
    %c0_1 = arith.constant 0 : index
    %2 = vector.load %arg4[%c0_0, %c0_1] : memref<7x80xf32, #tpu.memory_space<vmem>>, vector<7x80xf32>
    %3 = vector.extract_strided_slice %2 {offsets = [0, 0], sizes = [1, 80], strides = [1, 1]} : vector<7x80xf32> to vector<1x80xf32>
    %4 = vector.extract_strided_slice %2 {offsets = [1, 0], sizes = [1, 80], strides = [1, 1]} : vector<7x80xf32> to vector<1x80xf32>
    %5 = vector.extract_strided_slice %2 {offsets = [2, 0], sizes = [1, 80], strides = [1, 1]} : vector<7x80xf32> to vector<1x80xf32>
    %6 = vector.extract_strided_slice %2 {offsets = [3, 0], sizes = [1, 80], strides = [1, 1]} : vector<7x80xf32> to vector<1x80xf32>
    %7 = vector.extract_strided_slice %2 {offsets = [4, 0], sizes = [1, 80], strides = [1, 1]} : vector<7x80xf32> to vector<1x80xf32>
    %8 = vector.extract_strided_slice %2 {offsets = [5, 0], sizes = [1, 80], strides = [1, 1]} : vector<7x80xf32> to vector<1x80xf32>
    %9 = vector.extract_strided_slice %2 {offsets = [6, 0], sizes = [1, 80], strides = [1, 1]} : vector<7x80xf32> to vector<1x80xf32>
    %c0_2 = arith.constant 0 : index
    %c0_3 = arith.constant 0 : index
    %c0_4 = arith.constant 0 : index
    %10 = vector.load %arg2[%c0_2, %c0_3, %c0_4] : memref<2x8x80xf32, #tpu.memory_space<vmem>>, vector<2x8x80xf32>
    %11 = vector.broadcast %0 : f32 to vector<2x8x80xf32>
    %12 = arith.mulf %11, %10 : vector<2x8x80xf32>
    %cst = arith.constant 1.000000e+00 : f32
    %13 = arith.subf %cst, %0 : f32
    %c0_5 = arith.constant 0 : index
    %c0_6 = arith.constant 0 : index
    %c0_7 = arith.constant 0 : index
    %14 = vector.load %arg3[%c0_5, %c0_6, %c0_7] : memref<2x8x80xf32, #tpu.memory_space<vmem>>, vector<2x8x80xf32>
    %15 = vector.broadcast %13 : f32 to vector<2x8x80xf32>
    %16 = arith.mulf %15, %14 : vector<2x8x80xf32>
    %17 = arith.addf %12, %16 : vector<2x8x80xf32>
    %18 = vector.shape_cast %3 : vector<1x80xf32> to vector<1x1x80xf32>
    %19 = vector.broadcast %18 : vector<1x1x80xf32> to vector<2x8x80xf32>
    %20 = arith.mulf %17, %19 : vector<2x8x80xf32>
    %cst_8 = arith.constant dense<0.000000e+00> : vector<2x8xf32>
    %21 = vector.multi_reduction <add>, %20, %cst_8 [2] : vector<2x8x80xf32> to vector<2x8xf32>
    %22 = vector.shape_cast %21 : vector<2x8xf32> to vector<2x8x1xf32>
    %23 = vector.broadcast %1 : f32 to vector<2x8x1xf32>
    %24 = arith.addf %22, %23 : vector<2x8x1xf32>
    %25 = arith.negf %24 : vector<2x8x1xf32>
    %26 = math.exp %25 : vector<2x8x1xf32>
    %cst_9 = arith.constant 1.000000e+00 : f32
    %27 = vector.broadcast %cst_9 : f32 to vector<2x8x1xf32>
    %28 = arith.addf %27, %26 : vector<2x8x1xf32>
    %29 = arith.divf %27, %28 : vector<2x8x1xf32>
    %30 = math.exp %17 : vector<2x8x80xf32>
    %cst_10 = arith.constant dense<0.000000e+00> : vector<2x8xf32>
    %31 = vector.multi_reduction <add>, %30, %cst_10 [2] : vector<2x8x80xf32> to vector<2x8xf32>
    %32 = vector.shape_cast %31 : vector<2x8xf32> to vector<2x8x1xf32>
    %33 = arith.mulf %30, %17 : vector<2x8x80xf32>
    %cst_11 = arith.constant 0.000000e+00 : f32
    %34 = vector.broadcast %cst_11 : f32 to vector<2x1xf32>
    %cst_12 = arith.constant 0.000000e+00 : f32
    %35 = vector.broadcast %cst_12 : f32 to vector<2x80xf32>
    %36 = vector.extract_strided_slice %29 {offsets = [0, 0, 0], sizes = [2, 1, 1], strides = [1, 1, 1]} : vector<2x8x1xf32> to vector<2x1x1xf32>
    %37 = vector.shape_cast %36 : vector<2x1x1xf32> to vector<2x1xf32>
    %38 = arith.mulf %37, %34 : vector<2x1xf32>
    %39 = vector.extract_strided_slice %32 {offsets = [0, 0, 0], sizes = [2, 1, 1], strides = [1, 1, 1]} : vector<2x8x1xf32> to vector<2x1x1xf32>
    %40 = vector.shape_cast %39 : vector<2x1x1xf32> to vector<2x1xf32>
    %41 = arith.addf %38, %40 : vector<2x1xf32>
    %42 = vector.broadcast %37 : vector<2x1xf32> to vector<2x80xf32>
    %43 = arith.mulf %42, %35 : vector<2x80xf32>
    %44 = vector.extract_strided_slice %33 {offsets = [0, 0, 0], sizes = [2, 1, 80], strides = [1, 1, 1]} : vector<2x8x80xf32> to vector<2x1x80xf32>
    %45 = vector.shape_cast %44 : vector<2x1x80xf32> to vector<2x80xf32>
    %46 = arith.addf %43, %45 : vector<2x80xf32>
    %c0_13 = arith.constant 0 : index
    %c0_14 = arith.constant 0 : index
    %c0_15 = arith.constant 0 : index
    %47 = vector.load %arg7[%c0_13, %c0_14, %c0_15] : memref<2x8x1xf32, #tpu.memory_space<vmem>>, vector<2x1x1xf32>
    %48 = vector.shape_cast %47 : vector<2x1x1xf32> to vector<2x1xf32>
    %49 = vector.shape_cast %41 : vector<2x1xf32> to vector<2x1x1xf32>
    tpu.vector_store %arg7[%c0_13, %c0_14, %c0_15], %49 {strides = array<i32>} : memref<2x8x1xf32, #tpu.memory_space<vmem>>, vector<2x1x1xf32>,
    %c0_16 = arith.constant 0 : index
    %c0_17 = arith.constant 0 : index
    %c0_18 = arith.constant 0 : index
    %50 = vector.load %arg8[%c0_16, %c0_17, %c0_18] : memref<2x8x80xf32, #tpu.memory_space<vmem>>, vector<2x1x80xf32>
    %51 = vector.shape_cast %50 : vector<2x1x80xf32> to vector<2x80xf32>
    %52 = vector.shape_cast %46 : vector<2x80xf32> to vector<2x1x80xf32>
    tpu.vector_store %arg8[%c0_16, %c0_17, %c0_18], %52 {strides = array<i32>} : memref<2x8x80xf32, #tpu.memory_space<vmem>>, vector<2x1x80xf32>,
    %53 = vector.extract_strided_slice %29 {offsets = [0, 1, 0], sizes = [2, 1, 1], strides = [1, 1, 1]} : vector<2x8x1xf32> to vector<2x1x1xf32>
    %54 = vector.shape_cast %53 : vector<2x1x1xf32> to vector<2x1xf32>
    %55 = arith.mulf %54, %41 : vector<2x1xf32>
    %56 = vector.extract_strided_slice %32 {offsets = [0, 1, 0], sizes = [2, 1, 1], strides = [1, 1, 1]} : vector<2x8x1xf32> to vector<2x1x1xf32>
    %57 = vector.shape_cast %56 : vector<2x1x1xf32> to vector<2x1xf32>
    %58 = arith.addf %55, %57 : vector<2x1xf32>
    %59 = vector.broadcast %54 : vector<2x1xf32> to vector<2x80xf32>
    %60 = arith.mulf %59, %46 : vector<2x80xf32>
    %61 = vector.extract_strided_slice %33 {offsets = [0, 1, 0], sizes = [2, 1, 80], strides = [1, 1, 1]} : vector<2x8x80xf32> to vector<2x1x80xf32>
    %62 = vector.shape_cast %61 : vector<2x1x80xf32> to vector<2x80xf32>
    %63 = arith.addf %60, %62 : vector<2x80xf32>
    %c0_19 = arith.constant 0 : index
    %c1_20 = arith.constant 1 : index
    %c0_21 = arith.constant 0 : index
    %64 = vector.load %arg7[%c0_19, %c1_20, %c0_21] : memref<2x8x1xf32, #tpu.memory_space<vmem>>, vector<2x1x1xf32>
    %65 = vector.shape_cast %64 : vector<2x1x1xf32> to vector<2x1xf32>
    %66 = vector.shape_cast %58 : vector<2x1xf32> to vector<2x1x1xf32>
    tpu.vector_store %arg7[%c0_19, %c1_20, %c0_21], %66 {strides = array<i32>} : memref<2x8x1xf32, #tpu.memory_space<vmem>>, vector<2x1x1xf32>,
    %c0_22 = arith.constant 0 : index
    %c1_23 = arith.constant 1 : index
    %c0_24 = arith.constant 0 : index
    %67 = vector.load %arg8[%c0_22, %c1_23, %c0_24] : memref<2x8x80xf32, #tpu.memory_space<vmem>>, vector<2x1x80xf32>
    %68 = vector.shape_cast %67 : vector<2x1x80xf32> to vector<2x80xf32>
    %69 = vector.shape_cast %63 : vector<2x80xf32> to vector<2x1x80xf32>
    tpu.vector_store %arg8[%c0_22, %c1_23, %c0_24], %69 {strides = array<i32>} : memref<2x8x80xf32, #tpu.memory_space<vmem>>, vector<2x1x80xf32>,
    %70 = vector.extract_strided_slice %29 {offsets = [0, 2, 0], sizes = [2, 1, 1], strides = [1, 1, 1]} : vector<2x8x1xf32> to vector<2x1x1xf32>
    %71 = vector.shape_cast %70 : vector<2x1x1xf32> to vector<2x1xf32>
    %72 = arith.mulf %71, %58 : vector<2x1xf32>
    %73 = vector.extract_strided_slice %32 {offsets = [0, 2, 0], sizes = [2, 1, 1], strides = [1, 1, 1]} : vector<2x8x1xf32> to vector<2x1x1xf32>
    %74 = vector.shape_cast %73 : vector<2x1x1xf32> to vector<2x1xf32>
    %75 = arith.addf %72, %74 : vector<2x1xf32>
    %76 = vector.broadcast %71 : vector<2x1xf32> to vector<2x80xf32>
    %77 = arith.mulf %76, %63 : vector<2x80xf32>
    %78 = vector.extract_strided_slice %33 {offsets = [0, 2, 0], sizes = [2, 1, 80], strides = [1, 1, 1]} : vector<2x8x80xf32> to vector<2x1x80xf32>
    %79 = vector.shape_cast %78 : vector<2x1x80xf32> to vector<2x80xf32>
    %80 = arith.addf %77, %79 : vector<2x80xf32>
    %c0_25 = arith.constant 0 : index
    %c2 = arith.constant 2 : index
    %c0_26 = arith.constant 0 : index
    %81 = vector.load %arg7[%c0_25, %c2, %c0_26] : memref<2x8x1xf32, #tpu.memory_space<vmem>>, vector<2x1x1xf32>
    %82 = vector.shape_cast %81 : vector<2x1x1xf32> to vector<2x1xf32>
    %83 = vector.shape_cast %75 : vector<2x1xf32> to vector<2x1x1xf32>
    tpu.vector_store %arg7[%c0_25, %c2, %c0_26], %83 {strides = array<i32>} : memref<2x8x1xf32, #tpu.memory_space<vmem>>, vector<2x1x1xf32>,
    %c0_27 = arith.constant 0 : index
    %c2_28 = arith.constant 2 : index
    %c0_29 = arith.constant 0 : index
    %84 = vector.load %arg8[%c0_27, %c2_28, %c0_29] : memref<2x8x80xf32, #tpu.memory_space<vmem>>, vector<2x1x80xf32>
    %85 = vector.shape_cast %84 : vector<2x1x80xf32> to vector<2x80xf32>
    %86 = vector.shape_cast %80 : vector<2x80xf32> to vector<2x1x80xf32>
    tpu.vector_store %arg8[%c0_27, %c2_28, %c0_29], %86 {strides = array<i32>} : memref<2x8x80xf32, #tpu.memory_space<vmem>>, vector<2x1x80xf32>,
    %87 = vector.extract_strided_slice %29 {offsets = [0, 3, 0], sizes = [2, 1, 1], strides = [1, 1, 1]} : vector<2x8x1xf32> to vector<2x1x1xf32>
    %88 = vector.shape_cast %87 : vector<2x1x1xf32> to vector<2x1xf32>
    %89 = arith.mulf %88, %75 : vector<2x1xf32>
    %90 = vector.extract_strided_slice %32 {offsets = [0, 3, 0], sizes = [2, 1, 1], strides = [1, 1, 1]} : vector<2x8x1xf32> to vector<2x1x1xf32>
    %91 = vector.shape_cast %90 : vector<2x1x1xf32> to vector<2x1xf32>
    %92 = arith.addf %89, %91 : vector<2x1xf32>
    %93 = vector.broadcast %88 : vector<2x1xf32> to vector<2x80xf32>
    %94 = arith.mulf %93, %80 : vector<2x80xf32>
    %95 = vector.extract_strided_slice %33 {offsets = [0, 3, 0], sizes = [2, 1, 80], strides = [1, 1, 1]} : vector<2x8x80xf32> to vector<2x1x80xf32>
    %96 = vector.shape_cast %95 : vector<2x1x80xf32> to vector<2x80xf32>
    %97 = arith.addf %94, %96 : vector<2x80xf32>
    %c0_30 = arith.constant 0 : index
    %c3 = arith.constant 3 : index
    %c0_31 = arith.constant 0 : index
    %98 = vector.load %arg7[%c0_30, %c3, %c0_31] : memref<2x8x1xf32, #tpu.memory_space<vmem>>, vector<2x1x1xf32>
    %99 = vector.shape_cast %98 : vector<2x1x1xf32> to vector<2x1xf32>
    %100 = vector.shape_cast %92 : vector<2x1xf32> to vector<2x1x1xf32>
    tpu.vector_store %arg7[%c0_30, %c3, %c0_31], %100 {strides = array<i32>} : memref<2x8x1xf32, #tpu.memory_space<vmem>>, vector<2x1x1xf32>,
    %c0_32 = arith.constant 0 : index
    %c3_33 = arith.constant 3 : index
    %c0_34 = arith.constant 0 : index
    %101 = vector.load %arg8[%c0_32, %c3_33, %c0_34] : memref<2x8x80xf32, #tpu.memory_space<vmem>>, vector<2x1x80xf32>
    %102 = vector.shape_cast %101 : vector<2x1x80xf32> to vector<2x80xf32>
    %103 = vector.shape_cast %97 : vector<2x80xf32> to vector<2x1x80xf32>
    tpu.vector_store %arg8[%c0_32, %c3_33, %c0_34], %103 {strides = array<i32>} : memref<2x8x80xf32, #tpu.memory_space<vmem>>, vector<2x1x80xf32>,
    %104 = vector.extract_strided_slice %29 {offsets = [0, 4, 0], sizes = [2, 1, 1], strides = [1, 1, 1]} : vector<2x8x1xf32> to vector<2x1x1xf32>
    %105 = vector.shape_cast %104 : vector<2x1x1xf32> to vector<2x1xf32>
    %106 = arith.mulf %105, %92 : vector<2x1xf32>
    %107 = vector.extract_strided_slice %32 {offsets = [0, 4, 0], sizes = [2, 1, 1], strides = [1, 1, 1]} : vector<2x8x1xf32> to vector<2x1x1xf32>
    %108 = vector.shape_cast %107 : vector<2x1x1xf32> to vector<2x1xf32>
    %109 = arith.addf %106, %108 : vector<2x1xf32>
    %110 = vector.broadcast %105 : vector<2x1xf32> to vector<2x80xf32>
    %111 = arith.mulf %110, %97 : vector<2x80xf32>
    %112 = vector.extract_strided_slice %33 {offsets = [0, 4, 0], sizes = [2, 1, 80], strides = [1, 1, 1]} : vector<2x8x80xf32> to vector<2x1x80xf32>
    %113 = vector.shape_cast %112 : vector<2x1x80xf32> to vector<2x80xf32>
    %114 = arith.addf %111, %113 : vector<2x80xf32>
    %c0_35 = arith.constant 0 : index
    %c4 = arith.constant 4 : index
    %c0_36 = arith.constant 0 : index
    %115 = vector.load %arg7[%c0_35, %c4, %c0_36] : memref<2x8x1xf32, #tpu.memory_space<vmem>>, vector<2x1x1xf32>
    %116 = vector.shape_cast %115 : vector<2x1x1xf32> to vector<2x1xf32>
    %117 = vector.shape_cast %109 : vector<2x1xf32> to vector<2x1x1xf32>
    tpu.vector_store %arg7[%c0_35, %c4, %c0_36], %117 {strides = array<i32>} : memref<2x8x1xf32, #tpu.memory_space<vmem>>, vector<2x1x1xf32>,
    %c0_37 = arith.constant 0 : index
    %c4_38 = arith.constant 4 : index
    %c0_39 = arith.constant 0 : index
    %118 = vector.load %arg8[%c0_37, %c4_38, %c0_39] : memref<2x8x80xf32, #tpu.memory_space<vmem>>, vector<2x1x80xf32>
    %119 = vector.shape_cast %118 : vector<2x1x80xf32> to vector<2x80xf32>
    %120 = vector.shape_cast %114 : vector<2x80xf32> to vector<2x1x80xf32>
    tpu.vector_store %arg8[%c0_37, %c4_38, %c0_39], %120 {strides = array<i32>} : memref<2x8x80xf32, #tpu.memory_space<vmem>>, vector<2x1x80xf32>,
    %121 = vector.extract_strided_slice %29 {offsets = [0, 5, 0], sizes = [2, 1, 1], strides = [1, 1, 1]} : vector<2x8x1xf32> to vector<2x1x1xf32>
    %122 = vector.shape_cast %121 : vector<2x1x1xf32> to vector<2x1xf32>
    %123 = arith.mulf %122, %109 : vector<2x1xf32>
    %124 = vector.extract_strided_slice %32 {offsets = [0, 5, 0], sizes = [2, 1, 1], strides = [1, 1, 1]} : vector<2x8x1xf32> to vector<2x1x1xf32>
    %125 = vector.shape_cast %124 : vector<2x1x1xf32> to vector<2x1xf32>
    %126 = arith.addf %123, %125 : vector<2x1xf32>
    %127 = vector.broadcast %122 : vector<2x1xf32> to vector<2x80xf32>
    %128 = arith.mulf %127, %114 : vector<2x80xf32>
    %129 = vector.extract_strided_slice %33 {offsets = [0, 5, 0], sizes = [2, 1, 80], strides = [1, 1, 1]} : vector<2x8x80xf32> to vector<2x1x80xf32>
    %130 = vector.shape_cast %129 : vector<2x1x80xf32> to vector<2x80xf32>
    %131 = arith.addf %128, %130 : vector<2x80xf32>
    %c0_40 = arith.constant 0 : index
    %c5 = arith.constant 5 : index
    %c0_41 = arith.constant 0 : index
    %132 = vector.load %arg7[%c0_40, %c5, %c0_41] : memref<2x8x1xf32, #tpu.memory_space<vmem>>, vector<2x1x1xf32>
    %133 = vector.shape_cast %132 : vector<2x1x1xf32> to vector<2x1xf32>
    %134 = vector.shape_cast %126 : vector<2x1xf32> to vector<2x1x1xf32>
    tpu.vector_store %arg7[%c0_40, %c5, %c0_41], %134 {strides = array<i32>} : memref<2x8x1xf32, #tpu.memory_space<vmem>>, vector<2x1x1xf32>,
    %c0_42 = arith.constant 0 : index
    %c5_43 = arith.constant 5 : index
    %c0_44 = arith.constant 0 : index
    %135 = vector.load %arg8[%c0_42, %c5_43, %c0_44] : memref<2x8x80xf32, #tpu.memory_space<vmem>>, vector<2x1x80xf32>
    %136 = vector.shape_cast %135 : vector<2x1x80xf32> to vector<2x80xf32>
    %137 = vector.shape_cast %131 : vector<2x80xf32> to vector<2x1x80xf32>
    tpu.vector_store %arg8[%c0_42, %c5_43, %c0_44], %137 {strides = array<i32>} : memref<2x8x80xf32, #tpu.memory_space<vmem>>, vector<2x1x80xf32>,
    %138 = vector.extract_strided_slice %29 {offsets = [0, 6, 0], sizes = [2, 1, 1], strides = [1, 1, 1]} : vector<2x8x1xf32> to vector<2x1x1xf32>
    %139 = vector.shape_cast %138 : vector<2x1x1xf32> to vector<2x1xf32>
    %140 = arith.mulf %139, %126 : vector<2x1xf32>
    %141 = vector.extract_strided_slice %32 {offsets = [0, 6, 0], sizes = [2, 1, 1], strides = [1, 1, 1]} : vector<2x8x1xf32> to vector<2x1x1xf32>
    %142 = vector.shape_cast %141 : vector<2x1x1xf32> to vector<2x1xf32>
    %143 = arith.addf %140, %142 : vector<2x1xf32>
    %144 = vector.broadcast %139 : vector<2x1xf32> to vector<2x80xf32>
    %145 = arith.mulf %144, %131 : vector<2x80xf32>
    %146 = vector.extract_strided_slice %33 {offsets = [0, 6, 0], sizes = [2, 1, 80], strides = [1, 1, 1]} : vector<2x8x80xf32> to vector<2x1x80xf32>
    %147 = vector.shape_cast %146 : vector<2x1x80xf32> to vector<2x80xf32>
    %148 = arith.addf %145, %147 : vector<2x80xf32>
    %c0_45 = arith.constant 0 : index
    %c6 = arith.constant 6 : index
    %c0_46 = arith.constant 0 : index
    %149 = vector.load %arg7[%c0_45, %c6, %c0_46] : memref<2x8x1xf32, #tpu.memory_space<vmem>>, vector<2x1x1xf32>
    %150 = vector.shape_cast %149 : vector<2x1x1xf32> to vector<2x1xf32>
    %151 = vector.shape_cast %143 : vector<2x1xf32> to vector<2x1x1xf32>
    tpu.vector_store %arg7[%c0_45, %c6, %c0_46], %151 {strides = array<i32>} : memref<2x8x1xf32, #tpu.memory_space<vmem>>, vector<2x1x1xf32>,
    %c0_47 = arith.constant 0 : index
    %c6_48 = arith.constant 6 : index
    %c0_49 = arith.constant 0 : index
    %152 = vector.load %arg8[%c0_47, %c6_48, %c0_49] : memref<2x8x80xf32, #tpu.memory_space<vmem>>, vector<2x1x80xf32>
    %153 = vector.shape_cast %152 : vector<2x1x80xf32> to vector<2x80xf32>
    %154 = vector.shape_cast %148 : vector<2x80xf32> to vector<2x1x80xf32>
    tpu.vector_store %arg8[%c0_47, %c6_48, %c0_49], %154 {strides = array<i32>} : memref<2x8x80xf32, #tpu.memory_space<vmem>>, vector<2x1x80xf32>,
    %155 = vector.extract_strided_slice %29 {offsets = [0, 7, 0], sizes = [2, 1, 1], strides = [1, 1, 1]} : vector<2x8x1xf32> to vector<2x1x1xf32>
    %156 = vector.shape_cast %155 : vector<2x1x1xf32> to vector<2x1xf32>
    %157 = arith.mulf %156, %143 : vector<2x1xf32>
    %158 = vector.extract_strided_slice %32 {offsets = [0, 7, 0], sizes = [2, 1, 1], strides = [1, 1, 1]} : vector<2x8x1xf32> to vector<2x1x1xf32>
    %159 = vector.shape_cast %158 : vector<2x1x1xf32> to vector<2x1xf32>
    %160 = arith.addf %157, %159 : vector<2x1xf32>
    %161 = vector.broadcast %156 : vector<2x1xf32> to vector<2x80xf32>
    %162 = arith.mulf %161, %148 : vector<2x80xf32>
    %163 = vector.extract_strided_slice %33 {offsets = [0, 7, 0], sizes = [2, 1, 80], strides = [1, 1, 1]} : vector<2x8x80xf32> to vector<2x1x80xf32>
    %164 = vector.shape_cast %163 : vector<2x1x80xf32> to vector<2x80xf32>
    %165 = arith.addf %162, %164 : vector<2x80xf32>
    %c0_50 = arith.constant 0 : index
    %c7 = arith.constant 7 : index
    %c0_51 = arith.constant 0 : index
    %166 = vector.load %arg7[%c0_50, %c7, %c0_51] : memref<2x8x1xf32, #tpu.memory_space<vmem>>, vector<2x1x1xf32>
    %167 = vector.shape_cast %166 : vector<2x1x1xf32> to vector<2x1xf32>
    %168 = vector.shape_cast %160 : vector<2x1xf32> to vector<2x1x1xf32>
    tpu.vector_store %arg7[%c0_50, %c7, %c0_51], %168 {strides = array<i32>} : memref<2x8x1xf32, #tpu.memory_space<vmem>>, vector<2x1x1xf32>,
    %c0_52 = arith.constant 0 : index
    %c7_53 = arith.constant 7 : index
    %c0_54 = arith.constant 0 : index
    %169 = vector.load %arg8[%c0_52, %c7_53, %c0_54] : memref<2x8x80xf32, #tpu.memory_space<vmem>>, vector<2x1x80xf32>
    %170 = vector.shape_cast %169 : vector<2x1x80xf32> to vector<2x80xf32>
    %171 = vector.shape_cast %165 : vector<2x80xf32> to vector<2x1x80xf32>
    tpu.vector_store %arg8[%c0_52, %c7_53, %c0_54], %171 {strides = array<i32>} : memref<2x8x80xf32, #tpu.memory_space<vmem>>, vector<2x1x80xf32>,
    %c0_55 = arith.constant 0 : index
    %c0_56 = arith.constant 0 : index
    %c0_57 = arith.constant 0 : index
    %172 = vector.load %arg7[%c0_55, %c0_56, %c0_57] : memref<2x8x1xf32, #tpu.memory_space<vmem>>, vector<2x8x1xf32>
    %173 = vector.shape_cast %172 : vector<2x8x1xf32> to vector<16x1xf32>
    %c0_58 = arith.constant 0 : index
    %c0_59 = arith.constant 0 : index
    %c0_60 = arith.constant 0 : index
    %174 = vector.load %arg8[%c0_58, %c0_59, %c0_60] : memref<2x8x80xf32, #tpu.memory_space<vmem>>, vector<2x8x80xf32>
    %175 = vector.shape_cast %174 : vector<2x8x80xf32> to vector<16x80xf32>
    %cst_61 = arith.constant 9.99999993E-9 : f32
    %176 = vector.broadcast %cst_61 : f32 to vector<16x1xf32>
    %177 = arith.addf %173, %176 : vector<16x1xf32>
    %cst_62 = arith.constant 1.000000e+00 : f32
    %178 = vector.broadcast %cst_62 : f32 to vector<16x1xf32>
    %179 = arith.divf %178, %177 : vector<16x1xf32>
    %180 = vector.broadcast %179 : vector<16x1xf32> to vector<16x80xf32>
    %181 = arith.mulf %175, %180 : vector<16x80xf32>
    %cst_63 = arith.constant dense<0.000000e+00> : vector<16xf32>
    %182 = vector.multi_reduction <add>, %181, %cst_63 [1] : vector<16x80xf32> to vector<16xf32>
    %183 = vector.shape_cast %182 : vector<16xf32> to vector<16x1xf32>
    %cst_64 = arith.constant 8.000000e+01 : f32
    %184 = vector.broadcast %cst_64 : f32 to vector<16x1xf32>
    %185 = arith.divf %183, %184 : vector<16x1xf32>
    %186 = vector.broadcast %185 : vector<16x1xf32> to vector<16x80xf32>
    %187 = arith.subf %181, %186 : vector<16x80xf32>
    %188 = arith.mulf %187, %187 : vector<16x80xf32>
    %cst_65 = arith.constant dense<0.000000e+00> : vector<16xf32>
    %189 = vector.multi_reduction <add>, %188, %cst_65 [1] : vector<16x80xf32> to vector<16xf32>
    %190 = vector.shape_cast %189 : vector<16xf32> to vector<16x1xf32>
    %cst_66 = arith.constant 8.000000e+01 : f32
    %191 = vector.broadcast %cst_66 : f32 to vector<16x1xf32>
    %192 = arith.divf %190, %191 : vector<16x1xf32>
    %cst_67 = arith.constant 9.99999974E-6 : f32
    %193 = vector.broadcast %cst_67 : f32 to vector<16x1xf32>
    %194 = arith.addf %192, %193 : vector<16x1xf32>
    %195 = math.rsqrt %194 : vector<16x1xf32>
    %196 = vector.broadcast %195 : vector<16x1xf32> to vector<16x80xf32>
    %197 = arith.mulf %187, %196 : vector<16x80xf32>
    %198 = vector.broadcast %4 : vector<1x80xf32> to vector<16x80xf32>
    %199 = arith.mulf %197, %198 : vector<16x80xf32>
    %200 = vector.broadcast %5 : vector<1x80xf32> to vector<16x80xf32>
    %201 = arith.addf %199, %200 : vector<16x80xf32>
    %c0_68 = arith.constant 0 : index
    %c0_69 = arith.constant 0 : index
    %202 = vector.load %arg5[%c0_68, %c0_69] : memref<80x256xf32, #tpu.memory_space<vmem>>, vector<80x256xf32>
    %cst_70 = arith.constant dense<0.000000e+00> : vector<16x256xf32>
    %203 = tpu.matmul %201, %202, %cst_70 {dimension_numbers = #tpu.dot_dimension_numbers<[1], [0], [0], [1], [0, 0, 1, 1], [], []>} : vector<16x80xf32>, vector<80x256xf32>, vector<16x256xf32> -> vector<16x256xf32>
    %204 = vector.extract_strided_slice %203 {offsets = [0, 0], sizes = [16, 80], strides = [1, 1]} : vector<16x256xf32> to vector<16x80xf32>
    %205 = vector.broadcast %6 : vector<1x80xf32> to vector<16x80xf32>
    %206 = arith.addf %204, %205 : vector<16x80xf32>
    %207 = arith.negf %206 : vector<16x80xf32>
    %208 = math.exp %207 : vector<16x80xf32>
    %cst_71 = arith.constant 1.000000e+00 : f32
    %209 = vector.broadcast %cst_71 : f32 to vector<16x80xf32>
    %210 = arith.addf %209, %208 : vector<16x80xf32>
    %211 = arith.divf %209, %210 : vector<16x80xf32>
    %212 = vector.extract_strided_slice %203 {offsets = [0, 128], sizes = [16, 80], strides = [1, 1]} : vector<16x256xf32> to vector<16x80xf32>
    %213 = vector.broadcast %7 : vector<1x80xf32> to vector<16x80xf32>
    %214 = arith.addf %212, %213 : vector<16x80xf32>
    %215 = arith.mulf %211, %214 : vector<16x80xf32>
    %cst_72 = arith.constant dense<0.000000e+00> : vector<16xf32>
    %216 = vector.multi_reduction <add>, %215, %cst_72 [1] : vector<16x80xf32> to vector<16xf32>
    %217 = vector.shape_cast %216 : vector<16xf32> to vector<16x1xf32>
    %cst_73 = arith.constant 8.000000e+01 : f32
    %218 = vector.broadcast %cst_73 : f32 to vector<16x1xf32>
    %219 = arith.divf %217, %218 : vector<16x1xf32>
    %220 = vector.broadcast %219 : vector<16x1xf32> to vector<16x80xf32>
    %221 = arith.subf %215, %220 : vector<16x80xf32>
    %222 = arith.mulf %221, %221 : vector<16x80xf32>
    %cst_74 = arith.constant dense<0.000000e+00> : vector<16xf32>
    %223 = vector.multi_reduction <add>, %222, %cst_74 [1] : vector<16x80xf32> to vector<16xf32>
    %224 = vector.shape_cast %223 : vector<16xf32> to vector<16x1xf32>
    %cst_75 = arith.constant 8.000000e+01 : f32
    %225 = vector.broadcast %cst_75 : f32 to vector<16x1xf32>
    %226 = arith.divf %224, %225 : vector<16x1xf32>
    %cst_76 = arith.constant 9.99999974E-6 : f32
    %227 = vector.broadcast %cst_76 : f32 to vector<16x1xf32>
    %228 = arith.addf %226, %227 : vector<16x1xf32>
    %229 = math.rsqrt %228 : vector<16x1xf32>
    %230 = vector.broadcast %229 : vector<16x1xf32> to vector<16x80xf32>
    %231 = arith.mulf %221, %230 : vector<16x80xf32>
    %232 = vector.broadcast %8 : vector<1x80xf32> to vector<16x80xf32>
    %233 = arith.mulf %231, %232 : vector<16x80xf32>
    %234 = vector.broadcast %9 : vector<1x80xf32> to vector<16x80xf32>
    %235 = arith.addf %233, %234 : vector<16x80xf32>
    %236 = vector.shape_cast %235 : vector<16x80xf32> to vector<2x8x80xf32>
    %237 = arith.addf %17, %236 : vector<2x8x80xf32>
    %c0_77 = arith.constant 0 : index
    %c0_78 = arith.constant 0 : index
    %c0_79 = arith.constant 0 : index
    %238 = vector.load %arg6[%c0_77, %c0_78, %c0_79] : memref<2x8x80xf32, #tpu.memory_space<vmem>>, vector<2x8x80xf32>
    tpu.vector_store %arg6[%c0_77, %c0_78, %c0_79], %237 {strides = array<i32>} : memref<2x8x80xf32, #tpu.memory_space<vmem>>, vector<2x8x80xf32>,
    return
  }
  func.func @transform_0(%arg0: i32) -> i32 {
    %c0_i32 = arith.constant 0 : i32
    %c0_i32_0 = arith.constant 0 : i32
    return %c0_i32 : i32
  }
  func.func @transform_1(%arg0: i32) -> (i32, i32, i32) {
    %c0_i32 = arith.constant 0 : i32
    %c0_i32_0 = arith.constant 0 : i32
    %c0_i32_1 = arith.constant 0 : i32
    return %arg0, %c0_i32, %c0_i32_0 : i32, i32, i32
  }
  func.func @transform_2(%arg0: i32) -> (i32, i32, i32) {
    %c0_i32 = arith.constant 0 : i32
    %c0_i32_0 = arith.constant 0 : i32
    %c0_i32_1 = arith.constant 0 : i32
    return %arg0, %c0_i32, %c0_i32_0 : i32, i32, i32
  }
  func.func @transform_3(%arg0: i32) -> (i32, i32) {
    %c0_i32 = arith.constant 0 : i32
    %c0_i32_0 = arith.constant 0 : i32
    %c0_i32_1 = arith.constant 0 : i32
    return %c0_i32, %c0_i32_0 : i32, i32
  }
  func.func @transform_4(%arg0: i32) -> (i32, i32) {
    %c0_i32 = arith.constant 0 : i32
    %c0_i32_0 = arith.constant 0 : i32
    %c0_i32_1 = arith.constant 0 : i32
    return %c0_i32, %c0_i32_0 : i32, i32
  }
  func.func @transform_5(%arg0: i32) -> (i32, i32, i32) {
    %c0_i32 = arith.constant 0 : i32
    %c0_i32_0 = arith.constant 0 : i32
    %c0_i32_1 = arith.constant 0 : i32
    return %arg0, %c0_i32, %c0_i32_0 : i32, i32, i32
  }
}

</mosaic_0001>

<bundles_post_ra>
// kernel: tpu_custom_call.1
= control target key start
LH: loop header
LB: loop body
LE: loop exit
PB: predicated region body
PF: predicated region fallthrough
CT: control target
= control target key end

     0   :  { %10 = vsyncpa [#allocation7], 0  ;;  %s1005_s0 = inlined_call_operand.hbm [shape: f32[2], index: 0, kind: input, shape index: {}]   ;;  %s1006_s1 = inlined_call_operand.hbm [shape: f32[2,8,80], index: 1, kind: input, shape index: {}]   ;;  %s1007_s2 = inlined_call_operand.hbm [shape: f32[2,8,80], index: 2, kind: input, shape index: {}]   ;;  %s1008_s3 = inlined_call_operand.hbm [shape: f32[7,80], index: 3, kind: input, shape index: {}]   ;;  %s1009_s4 = inlined_call_operand.hbm [shape: f32[80,256], index: 4, kind: input, shape index: {}]   ;;  %s1010_s5 = inlined_call_operand.hbm [shape: f32[2,8,80], index: 5, kind: output, shape index: {}]  }
   0x1   :  { %11 = vsyncpa [#allocation5], 0 }
   0x2   :  { %12 = vsyncpa [#allocation10], 0 }
   0x3   :  { %13 = vsyncpa [#allocation13], 0 }
   0x4   :  { %14 = vsyncpa [#allocation6], 0  ;;  %s778_s18 = smov [#allocation9]   ;;  %s779_s20 = smov [#allocation8]  }
   0x5   :  { %s40_s19 = sshll.u32 %s778_s18, 4  ;;  %s28_s21 = sshll.u32 %s779_s20, 4  ;;  %s41_s19 = int_to_ptr.vmem [resolvable:$true] %s40_s19  ;;  %s29_s21 = int_to_ptr.vmem [resolvable:$true] %s28_s21 }
   0x6   :  { %s668_s22 = scalar_lea.vmem %s41_s19, 256  ;;  %p673_p1 = scmp.lt.s32.totalorder %s41_s19, %s41_s19 }
   0x7   :  { %p669_p0 = scmp.ne.s32.totalorder %s41_s19, %s668_s22  ;;  %p674_p2 = scmp.lt.s32.totalorder %s668_s22, %s668_s22 }
   0x9   :  { %p675_p3 = por %p674_p2, %p673_p1 }
   0xb   :  { %p676_p4 = pnand %p675_p3, %p669_p0 }
   0xd   :  { %679 = shalt.err (!%p676_p4)
}
   0xe   :  { %s780_s23 = smov 128   ;;  %s781_s24 = smov 8  }
   0xf   :  { %46 = dma.hbm_to_vmem [thread:$0]  %s1007_s2, 256, %s41_s19, [#allocation10], %s780_s23, %s780_s23, %s781_s24  }
  0x10   :  { %s782_s27 = smov [#allocation4]   ;;  %s696_s30 = scalar_lea.vmem %s29_s21, 256 }
  0x11   :  { %22 = dma.hbm_to_smem %s1005_s0, 16, %s782_s27, [#allocation7]  }
  0x12   :  { %p697_p5 = scmp.ne.s32.totalorder %s29_s21, %s696_s30  ;;  %p701_p6 = scmp.lt.s32.totalorder %s29_s21, %s29_s21 }
  0x13   :  { %p702_p7 = scmp.lt.s32.totalorder %s696_s30, %s696_s30 }
  0x15   :  { %p703_p8 = por %p702_p7, %p701_p6 }
  0x17   :  { %p704_p9 = pnand %p703_p8, %p697_p5 }
  0x19   :  { %707 = shalt.err (!%p704_p9)
}
  0x1a   :  { %34 = dma.hbm_to_vmem [thread:$0]  %s1006_s1, 256, %s29_s21, [#allocation5], %s780_s23, %s780_s23, %s781_s24  }
  0x1b   :  { %s783_s2 = smov [#allocation11]   ;;  %s784_s9 = smov [#allocation12]  }
  0x1c   :  { %s53_s8 = sshll.u32 %s783_s2, 4  ;;  %s62_s0 = sshll.u32 %s784_s9, 4  ;;  %s54_s8 = int_to_ptr.vmem [resolvable:$true] %s53_s8  ;;  %s63_s0 = int_to_ptr.vmem [resolvable:$true] %s62_s0 }
  0x1d   :  { %s716_s10 = scalar_lea.vmem %s54_s8, 128  ;;  %p721_p11 = scmp.lt.s32.totalorder %s54_s8, %s54_s8 }
  0x1e   :  { %p717_p10 = scmp.ne.s32.totalorder %s54_s8, %s716_s10  ;;  %p722_p12 = scmp.lt.s32.totalorder %s716_s10, %s716_s10 }
  0x20   :  { %p723_p13 = por %p722_p12, %p721_p11 }
  0x22   :  { %p724_p0 = pnand %p723_p13, %p717_p10 }
  0x24   :  { %727 = shalt.err (!%p724_p0)
}
  0x25   :  { %56 = dma.hbm_to_vmem [thread:$0]  %s1008_s3, 128, %s54_s8, [#allocation10]  }
  0x26   :  { %s736_s13 = scalar_lea.vmem %s63_s0, 2560  ;;  %p741_p2 = scmp.lt.s32.totalorder %s63_s0, %s63_s0 }
  0x27   :  { %p737_p1 = scmp.ne.s32.totalorder %s63_s0, %s736_s13  ;;  %p742_p3 = scmp.lt.s32.totalorder %s736_s13, %s736_s13 }
  0x29   :  { %p743_p4 = por %p742_p3, %p741_p2 }
  0x2b   :  { %p744_p5 = pnand %p743_p4, %p737_p1 }
  0x2d   :  { %747 = shalt.err (!%p744_p5)
}
  0x2e   :  { %s785_s1 = smov 256   ;;  %s786_s14 = smov 16  }
  0x2f   :  { %68 = dma.hbm_to_vmem [thread:$0]  %s1009_s4, 2560, %s63_s0, [#allocation13], %s785_s1, %s785_s1, %s786_s14  }
  0x30   :  { %768 = dma.done.wait [#allocation7], 16  }
  0x31   :  { %769 = vsyncadd [#allocation7], 4294967280 }
  0x32   :  { %770 = dma.done.wait [#allocation5], 256  }
  0x33   :  { %771 = vsyncadd [#allocation5], 4294967040 }
  0x34   :  { %772 = dma.done.wait [#allocation10], 384  }
  0x35   :  { %773 = vsyncadd [#allocation10], 4294966912 }
  0x36   :  { %774 = dma.done.wait [#allocation13], 2560  }
  0x37   :  { %775 = vsyncadd [#allocation13], 4294964736 }
  0x38   :  { %84 = sfence }
  0x39   :  { %s85_s3 = sld [smem:[#allocation4]]  ;;  %v101_v0 = vlaneseq  ;;  %v88_v2 = vld [vmem:[#allocation8] sm:$0xff]  ;;  %v89_v3 = vld [vmem:[#allocation8 + $0x8] sm:$0xff]  ;;  %v94_v7 = vld [vmem:[#allocation9] sm:$0xff]  ;;  %vm107_vm0 = vcmask 654336   ;;  %v787_v27 = vmov 0  }
  0x3a   :  { %v844_v5 = vld [vmem:[#allocation11] sm:$0x7f]  ;;  %v95_v8 = vld [vmem:[#allocation9 + $0x8] sm:$0xff]  ;;  %626 = vset.pattern.permute.xlu0 %v787_v27  ;;  %627 = vset.pattern.permute.xlu1 %v787_v27  ;;  %s587_s17 = sld [smem:[#allocation4 + $0x1]]  ;;  %vm147_vm1 = vcmask 0   ;;  %vm150_vm2 = vcmask 647168  }
  0x3b   :  { %v841_v1 = vshrl.u32 %v101_v0, 7  ;;  %vm173_vm3 = vcmask 1025   ;;  %vm176_vm4 = vcmask 648193   ;;  %vm199_vm5 = vcmask 2050   ;;  %s789_s18 = smov [#allocation14]  }
  0x3c   :  { %vm202_vm6 = vcmask 649218   ;;  %vm225_vm7 = vcmask 3075   ;;  %vm228_vm8 = vcmask 650243   ;;  %vm251_vm9 = vcmask 4100   ;;  %s572_s19 = sshll.u32 %s789_s18, 4  ;;  %s573_s19 = int_to_ptr.vmem [resolvable:$true] %s572_s19 }
  0x3d   :  { %v103_v4 = vsub.s32 0, %v841_v1  ;;  %vm254_vm10 = vcmask 651268   ;;  %vm277_vm11 = vcmask 5125   ;;  %vm280_vm12 = vcmask 652293   ;;  %s748_s20 = scalar_lea.vmem %s573_s19, 256  ;;  %p753_p7 = scmp.lt.s32.totalorder %s573_s19, %s573_s19 }
  0x3e   :  { %vm303_vm13 = vcmask 6150   ;;  %vm306_vm14 = vcmask 653318   ;;  %vm329_vm15 = vcmask 7175   ;;  %p749_p6 = scmp.ne.s32.totalorder %s573_s19, %s748_s20  ;;  %p754_p8 = scmp.lt.s32.totalorder %s748_s20, %s748_s20 }
  0x3f   :  { %v90_v6 = vstv %s85_s3  ;;  %s93_s4 = ssub.f32 1.0, %s85_s3  ;;  %v104_v13 = vrot.slane %v844_v5, %v103_v4 }
  0x40   :  { %v91_v9 = vmul.f32 %v90_v6, %v88_v2  ;;  %v92_v10 = vmul.f32 %v90_v6, %v89_v3  ;;  %v114_v28 = vstv %s587_s17  ;;  %p755_p9 = por %p754_p8, %p753_p7 }
  0x41   :  { %v96_v11 = vstv %s93_s4 }
  0x42   :  { %v97_v12 = vmul.f32 %v96_v11, %v94_v7  ;;  %v98_v14 = vmul.f32 %v96_v11, %v95_v8  ;;  %p756_p10 = pnand %p755_p9, %p749_p6 }
  0x44   :  { %v847_v15 = vadd.f32 %v97_v12, %v91_v9  ;;  %v849_v16 = vadd.f32 %v98_v14, %v92_v10 }
  0x46   :  { %v105_v17 = vmul.f32 %v104_v13, %v847_v15  ;;  %v106_v18 = vmul.f32 %v104_v13, %v849_v16  ;;  %v129_v19 = vmul.f32 1.442695, %v847_v15  ;;  %v131_v20 = vmul.f32 1.442695, %v849_v16 }
  0x48   :  { %v108_v21 = vsel %vm107_vm0, %v105_v17, 0.0  ;;  %628 = vpow2.f32 %v129_v19  ;;  %v111_v22 = vsel %vm107_vm0, %v106_v18, 0.0 }
  0x49   :  { %109 = vadd.xlane.f32.xlu0 %v108_v21  ;;  %630 = vpow2.f32 %v131_v20 }
  0x4d   :  { %112 = vadd.xlane.f32.xlu0 %v111_v22 }
  0x55   :  { %v629_v23 = vpop.eup %628 }
  0x56   :  { %v631_v24 = vpop.eup %630  ;;  %v133_v25 = vsel %vm107_vm0, %v629_v23, 0.0  ;;  %v862_v40 = vmul.f32 %v629_v23, %v847_v15 }
  0x57   :  { %134 = vadd.xlane.f32.xlu1 %v133_v25  ;;  %v136_v26 = vsel %vm107_vm0, %v631_v24, 0.0  ;;  %v868_v43 = vmul.f32 %v631_v24, %v849_v16 }
  0x5b   :  { %137 = vadd.xlane.f32.xlu1 %v136_v26 }
  0xd2   :  { %v110_v29 = vpop.xlane.xlu0 %109 }
  0xd3   :  { %v115_v30 = vadd.f32 %v114_v28, %v110_v29 }
  0xd5   :  { %v588_v31 = vmul.f32 -1.442695, %v115_v30 }
  0xd6   :  { %v113_v32 = vpop.xlane.xlu0 %112 }
  0xd7   :  { %632 = vpow2.f32 %v588_v31  ;;  %v116_v33 = vadd.f32 %v114_v28, %v113_v32 }
  0xd9   :  { %v589_v34 = vmul.f32 -1.442695, %v116_v33 }
  0xdb   :  { %634 = vpow2.f32 %v589_v34 }
  0xe0   :  { %v859_v39 = vpop.xlane.xlu1 %134 }
  0xe4   :  { %v633_v35 = vpop.eup %632  ;;  %v874_v47 = vpop.xlane.xlu1 %137 }
  0xe5   :  { %v123_v36 = vadd.f32 1.0, %v633_v35 }
  0xe7   :  { %636 = vrcp.f32 %v123_v36 }
  0xe8   :  { %v635_v37 = vpop.eup %634 }
  0xe9   :  { %v124_v38 = vadd.f32 1.0, %v635_v37 }
  0xeb   :  { %638 = vrcp.f32 %v124_v38 }
  0xf4   :  { %v864_v41 = vpop.eup %636 }
  0xf5   :  { %v141_v42 = vmul.f32 0.0, %v864_v41 }
  0xf7   :  { %v143_v44 = vadd.f32 %v141_v42, %v859_v39  ;;  %v145_v45 = vadd.f32 %v141_v42, %v862_v40 }
  0xf8   :  { %v872_v46 = vpop.eup %638 }
  0xf9   :  { %148 = vst.msk [vmem:[#allocation2] sm:$0x1] %vm147_vm1, %v143_v44  ;;  %v155_v48 = vrot.slane %v143_v44, 7  ;;  %v165_v49 = vrot.slane %v145_v45, 7  ;;  %v142_v50 = vmul.f32 0.0, %v872_v46 }
  0xfa   :  { %151 = vst.msk [vmem:[#allocation3] sm:$0x1] %vm150_vm2, %v145_v45 }
  0xfb   :  { %v159_v51 = vmul.f32 %v864_v41, %v155_v48  ;;  %v169_v52 = vmul.f32 %v864_v41, %v165_v49  ;;  %v144_v53 = vadd.f32 %v142_v50, %v874_v47  ;;  %v146_v54 = vadd.f32 %v142_v50, %v868_v43 }
  0xfd   :  { %v161_v55 = vadd.f32 %v159_v51, %v859_v39  ;;  %v171_v56 = vadd.f32 %v169_v52, %v862_v40  ;;  %149 = vst.msk [vmem:[#allocation2 + $0x8] sm:$0x1] %vm147_vm1, %v144_v53  ;;  %v156_v57 = vrot.slane %v144_v53, 7  ;;  %v166_v58 = vrot.slane %v146_v54, 7 }
  0xfe   :  { %152 = vst.msk [vmem:[#allocation3 + $0x8] sm:$0x1] %vm150_vm2, %v146_v54  ;;  %vm332_vm1 = vcmask 654343  }
  0xff   :  { %174 = vst.msk [vmem:[#allocation2] sm:$0x2] %vm173_vm3, %v161_v55  ;;  %v181_v59 = vrot.slane %v161_v55, 7  ;;  %v191_v60 = vrot.slane %v171_v56, 7  ;;  %v160_v61 = vmul.f32 %v872_v46, %v156_v57  ;;  %v170_v62 = vmul.f32 %v872_v46, %v166_v58 }
 0x100   :  { %177 = vst.msk [vmem:[#allocation3] sm:$0x2] %vm176_vm4, %v171_v56 }
 0x101   :  { %v185_v63 = vmul.f32 %v864_v41, %v181_v59  ;;  %v195_v0 = vmul.f32 %v864_v41, %v191_v60  ;;  %v162_v2 = vadd.f32 %v160_v61, %v874_v47  ;;  %v172_v3 = vadd.f32 %v170_v62, %v868_v43 }
 0x103   :  { %v187_v4 = vadd.f32 %v185_v63, %v859_v39  ;;  %175 = vst.msk [vmem:[#allocation2 + $0x8] sm:$0x2] %vm173_vm3, %v162_v2  ;;  %v182_v6 = vrot.slane %v162_v2, 7  ;;  %v192_v7 = vrot.slane %v172_v3, 7  ;;  %v197_v8 = vadd.f32 %v195_v0, %v862_v40 }
 0x104   :  { %178 = vst.msk [vmem:[#allocation3 + $0x8] sm:$0x2] %vm176_vm4, %v172_v3 }
 0x105   :  { %200 = vst.msk [vmem:[#allocation2] sm:$0x4] %vm199_vm5, %v187_v4  ;;  %v207_v9 = vrot.slane %v187_v4, 7  ;;  %v186_v10 = vmul.f32 %v872_v46, %v182_v6  ;;  %v196_v11 = vmul.f32 %v872_v46, %v192_v7  ;;  %v217_v12 = vrot.slane %v197_v8, 7 }
 0x106   :  { %203 = vst.msk [vmem:[#allocation3] sm:$0x4] %vm202_vm6, %v197_v8 }
 0x107   :  { %v211_v13 = vmul.f32 %v864_v41, %v207_v9  ;;  %v188_v14 = vadd.f32 %v186_v10, %v874_v47  ;;  %v221_v17 = vmul.f32 %v864_v41, %v217_v12  ;;  %v198_v18 = vadd.f32 %v196_v11, %v868_v43 }
 0x109   :  { %v213_v19 = vadd.f32 %v211_v13, %v859_v39  ;;  %201 = vst.msk [vmem:[#allocation2 + $0x8] sm:$0x4] %vm199_vm5, %v188_v14  ;;  %v208_v20 = vrot.slane %v188_v14, 7  ;;  %v223_v21 = vadd.f32 %v221_v17, %v862_v40  ;;  %v218_v22 = vrot.slane %v198_v18, 7 }
 0x10a   :  { %204 = vst.msk [vmem:[#allocation3 + $0x8] sm:$0x4] %vm202_vm6, %v198_v18 }
 0x10b   :  { %226 = vst.msk [vmem:[#allocation2] sm:$0x8] %vm225_vm7, %v213_v19  ;;  %v233_v23 = vrot.slane %v213_v19, 7  ;;  %v212_v24 = vmul.f32 %v872_v46, %v208_v20  ;;  %v243_v25 = vrot.slane %v223_v21, 7  ;;  %v222_v26 = vmul.f32 %v872_v46, %v218_v22 }
 0x10c   :  { %229 = vst.msk [vmem:[#allocation3] sm:$0x8] %vm228_vm8, %v223_v21 }
 0x10d   :  { %v237_v27 = vmul.f32 %v864_v41, %v233_v23  ;;  %v214_v28 = vadd.f32 %v212_v24, %v874_v47  ;;  %v247_v29 = vmul.f32 %v864_v41, %v243_v25  ;;  %v224_v30 = vadd.f32 %v222_v26, %v868_v43 }
 0x10f   :  { %v239_v31 = vadd.f32 %v237_v27, %v859_v39  ;;  %227 = vst.msk [vmem:[#allocation2 + $0x8] sm:$0x8] %vm225_vm7, %v214_v28  ;;  %v234_v32 = vrot.slane %v214_v28, 7  ;;  %v249_v33 = vadd.f32 %v247_v29, %v862_v40  ;;  %v244_v34 = vrot.slane %v224_v30, 7 }
 0x110   :  { %230 = vst.msk [vmem:[#allocation3 + $0x8] sm:$0x8] %vm228_vm8, %v224_v30 }
 0x111   :  { %252 = vst.msk [vmem:[#allocation2] sm:$0x10] %vm251_vm9, %v239_v31  ;;  %v259_v35 = vrot.slane %v239_v31, 7  ;;  %v238_v36 = vmul.f32 %v872_v46, %v234_v32  ;;  %v269_v37 = vrot.slane %v249_v33, 7  ;;  %v248_v38 = vmul.f32 %v872_v46, %v244_v34 }
 0x112   :  { %255 = vst.msk [vmem:[#allocation3] sm:$0x10] %vm254_vm10, %v249_v33 }
 0x113   :  { %v263_v42 = vmul.f32 %v864_v41, %v259_v35  ;;  %v240_v44 = vadd.f32 %v238_v36, %v874_v47  ;;  %v273_v45 = vmul.f32 %v864_v41, %v269_v37  ;;  %v250_v48 = vadd.f32 %v248_v38, %v868_v43 }
 0x115   :  { %v265_v49 = vadd.f32 %v263_v42, %v859_v39  ;;  %253 = vst.msk [vmem:[#allocation2 + $0x8] sm:$0x10] %vm251_vm9, %v240_v44  ;;  %v260_v50 = vrot.slane %v240_v44, 7  ;;  %v275_v51 = vadd.f32 %v273_v45, %v862_v40  ;;  %v270_v52 = vrot.slane %v250_v48, 7  ;;  %v415_v42 = vld [vmem:[#allocation12 + $0x98] sm:$0xff]  ;;  %v414_v44 = vld [vmem:[#allocation12 + $0x90] sm:$0xff] }
 0x116   :  { %256 = vst.msk [vmem:[#allocation3 + $0x8] sm:$0x10] %vm254_vm10, %v250_v48  ;;  %434 = vmatprep.subr.mxu0 %v415_v42  ;;  %594 = vmatprep.subr.mxu1 %v415_v42  ;;  %v413_v45 = vld [vmem:[#allocation12 + $0x88] sm:$0xff]  ;;  %v412_v48 = vld [vmem:[#allocation12 + $0x80] sm:$0xff] }
 0x117   :  { %278 = vst.msk [vmem:[#allocation2] sm:$0x20] %vm277_vm11, %v265_v49  ;;  %v285_v53 = vrot.slane %v265_v49, 7  ;;  %v264_v54 = vmul.f32 %v872_v46, %v260_v50  ;;  %v295_v55 = vrot.slane %v275_v51, 7  ;;  %v274_v56 = vmul.f32 %v872_v46, %v270_v52  ;;  %435 = vmatpush1.msra.mxu0 %v414_v44  ;;  %604 = vmatpush1.msra.mxu1 %v414_v44  ;;  %v411_v49 = vld [vmem:[#allocation12 + $0x78] sm:$0xff]  ;;  %v410_v50 = vld [vmem:[#allocation12 + $0x70] sm:$0xff] }
 0x118   :  { %281 = vst.msk [vmem:[#allocation3] sm:$0x20] %vm280_vm12, %v275_v51  ;;  %436 = vmatprep.subr.mxu0 %v413_v45  ;;  %595 = vmatprep.subr.mxu1 %v413_v45  ;;  %v409_v51 = vld [vmem:[#allocation12 + $0x68] sm:$0xff]  ;;  %v408_v52 = vld [vmem:[#allocation12 + $0x60] sm:$0xff] }
 0x119   :  { %v289_v57 = vmul.f32 %v864_v41, %v285_v53  ;;  %v266_v58 = vadd.f32 %v264_v54, %v874_v47  ;;  %v299_v59 = vmul.f32 %v864_v41, %v295_v55  ;;  %v276_v60 = vadd.f32 %v274_v56, %v868_v43  ;;  %437 = vmatpush1.msra.mxu0 %v412_v48  ;;  %v407_v53 = vld [vmem:[#allocation12 + $0x58] sm:$0xff]  ;;  %v406_v54 = vld [vmem:[#allocation12 + $0x50] sm:$0xff]  ;;  %v405_v55 = vld [vmem:[#allocation12 + $0x48] sm:$0xff] }
 0x11a   :  { %605 = vmatpush1.msra.mxu1 %v412_v48  ;;  %438 = vmatprep.subr.mxu0 %v411_v49  ;;  %v404_v56 = vld [vmem:[#allocation12 + $0x40] sm:$0xff] }
 0x11b   :  { %v291_v61 = vadd.f32 %v289_v57, %v859_v39  ;;  %279 = vst.msk [vmem:[#allocation2 + $0x8] sm:$0x20] %vm277_vm11, %v266_v58  ;;  %v286_v62 = vrot.slane %v266_v58, 7  ;;  %v301_v63 = vadd.f32 %v299_v59, %v862_v40  ;;  %v296_v0 = vrot.slane %v276_v60, 7  ;;  %596 = vmatprep.subr.mxu1 %v411_v49  ;;  %439 = vmatpush1.msra.mxu0 %v410_v50  ;;  %v403_v57 = vld [vmem:[#allocation12 + $0x38] sm:$0xff]  ;;  %v402_v58 = vld [vmem:[#allocation12 + $0x30] sm:$0xff] }
 0x11c   :  { %282 = vst.msk [vmem:[#allocation3 + $0x8] sm:$0x20] %vm280_vm12, %v276_v60  ;;  %606 = vmatpush1.msra.mxu1 %v410_v50  ;;  %440 = vmatprep.subr.mxu0 %v409_v51  ;;  %v401_v59 = vld [vmem:[#allocation12 + $0x28] sm:$0xff]  ;;  %v400_v60 = vld [vmem:[#allocation12 + $0x20] sm:$0xff] }
 0x11d   :  { %304 = vst.msk [vmem:[#allocation2] sm:$0x40] %vm303_vm13, %v291_v61  ;;  %v311_v2 = vrot.slane %v291_v61, 7  ;;  %v290_v3 = vmul.f32 %v872_v46, %v286_v62  ;;  %v321_v4 = vrot.slane %v301_v63, 7  ;;  %v300_v6 = vmul.f32 %v872_v46, %v296_v0  ;;  %597 = vmatprep.subr.mxu1 %v409_v51  ;;  %441 = vmatpush1.msra.mxu0 %v408_v52  ;;  %v399_v61 = vld [vmem:[#allocation12 + $0x18] sm:$0xff]  ;;  %v398_v62 = vld [vmem:[#allocation12 + $0x10] sm:$0xff] }
 0x11e   :  { %307 = vst.msk [vmem:[#allocation3] sm:$0x40] %vm306_vm14, %v301_v63  ;;  %607 = vmatpush1.msra.mxu1 %v408_v52  ;;  %442 = vmatprep.subr.mxu0 %v407_v53  ;;  %v397_v63 = vld [vmem:[#allocation12 + $0x8] sm:$0xff]  ;;  %v396_v0 = vld [vmem:[#allocation12] sm:$0xff] }
 0x11f   :  { %v315_v7 = vmul.f32 %v864_v41, %v311_v2  ;;  %v292_v8 = vadd.f32 %v290_v3, %v874_v47  ;;  %v325_v9 = vmul.f32 %v864_v41, %v321_v4  ;;  %v302_v10 = vadd.f32 %v300_v6, %v868_v43  ;;  %598 = vmatprep.subr.mxu1 %v407_v53 }
 0x120   :  { %443 = vmatpush1.msra.mxu0 %v406_v54  ;;  %608 = vmatpush1.msra.mxu1 %v406_v54  ;;  %v788_v2 = vmov 0.0  }
 0x121   :  { %v317_v11 = vadd.f32 %v315_v7, %v859_v39  ;;  %305 = vst.msk [vmem:[#allocation2 + $0x8] sm:$0x40] %vm303_vm13, %v292_v8  ;;  %v312_v12 = vrot.slane %v292_v8, 7  ;;  %v327_v13 = vadd.f32 %v325_v9, %v862_v40  ;;  %v322_v14 = vrot.slane %v302_v10, 7  ;;  %444 = vmatprep.subr.mxu0 %v405_v55  ;;  %599 = vmatprep.subr.mxu1 %v405_v55 }
 0x122   :  { %308 = vst.msk [vmem:[#allocation3 + $0x8] sm:$0x40] %vm306_vm14, %v302_v10  ;;  %445 = vmatpush1.msra.mxu0 %v404_v56  ;;  %609 = vmatpush1.msra.mxu1 %v404_v56  ;;  %v386_v10 = vsub.s32 1, %v841_v1 }
 0x123   :  { %330 = vst.msk [vmem:[#allocation2] sm:$0x80] %vm329_vm15, %v317_v11  ;;  %v316_v17 = vmul.f32 %v872_v46, %v312_v12  ;;  %v326_v41 = vmul.f32 %v872_v46, %v322_v14  ;;  %446 = vmatprep.subr.mxu0 %v403_v57  ;;  %600 = vmatprep.subr.mxu1 %v403_v57  ;;  %v392_v11 = vsub.s32 2, %v841_v1 }
 0x124   :  { %333 = vst.msk [vmem:[#allocation3] sm:$0x80] %vm332_vm1, %v327_v13  ;;  %447 = vmatpush1.msra.mxu0 %v402_v58  ;;  %610 = vmatpush1.msra.mxu1 %v402_v58  ;;  %v387_v12 = vrot.slane %v844_v5, %v386_v10 }
 0x125   :  { %v318_v18 = vadd.f32 %v316_v17, %v874_v47  ;;  %v328_v19 = vadd.f32 %v326_v41, %v868_v43  ;;  %448 = vmatprep.subr.mxu0 %v401_v59  ;;  %601 = vmatprep.subr.mxu1 %v401_v59  ;;  %v393_v17 = vrot.slane %v844_v5, %v392_v11 }
 0x126   :  { %449 = vmatpush1.msra.mxu0 %v400_v60  ;;  %611 = vmatpush1.msra.mxu1 %v400_v60 }
 0x127   :  { %331 = vst.msk [vmem:[#allocation2 + $0x8] sm:$0x80] %vm329_vm15, %v318_v18  ;;  %450 = vmatprep.subr.mxu0 %v399_v61  ;;  %486 = vmatprep.mubr.f32.mxu0 %v788_v2 }
 0x128   :  { %334 = vst.msk [vmem:[#allocation3 + $0x8] sm:$0x80] %vm332_vm1, %v328_v19  ;;  %451 = vmatpush1.msra.mxu0 %v398_v62  ;;  %602 = vmatprep.subr.mxu1 %v399_v61 }
 0x129   :  { %452 = vmatprep.subr.mxu0 %v397_v63  ;;  %612 = vmatpush1.msra.mxu1 %v398_v62 }
 0x12a   :  { %v335_v39 = vld [vmem:[#allocation2] sm:$0xff]  ;;  %453 = vmatpush1.msra.mxu0 %v396_v0  ;;  %603 = vmatprep.subr.mxu1 %v397_v63 }
 0x12b   :  { %v339_v20 = vadd.f32 1e-08, %v335_v39  ;;  %v337_v24 = vld [vmem:[#allocation3] sm:$0xff]  ;;  %613 = vmatpush1.msra.mxu1 %v396_v0  ;;  %492 = vmatprep.mubr.f32.mxu1 %v788_v2  ;;  %v553_v0 = vsub.s32 5, %v841_v1  ;;  %v559_v2 = vsub.s32 6, %v841_v1 }
 0x12d   :  { %640 = vrcp.f32 %v339_v20 }
 0x12e   :  { %v336_v21 = vld [vmem:[#allocation2 + $0x8] sm:$0xff] }
 0x12f   :  { %v340_v40 = vadd.f32 1e-08, %v336_v21  ;;  %v338_v47 = vld [vmem:[#allocation3 + $0x8] sm:$0xff] }
 0x131   :  { %642 = vrcp.f32 %v340_v40  ;;  %v501_v40 = vsub.s32 3, %v841_v1 }
 0x13a   :  { %v641_v22 = vpop.eup %640 }
 0x13b   :  { %347 = vperm.xlu0 %626, %v641_v22   ;;  %v502_v22 = vrot.slane %v844_v5, %v501_v40 }
 0x13e   :  { %v643_v23 = vpop.eup %642 }
 0x13f   :  { %352 = vperm.xlu1 %627, %v643_v23  }
 0x1b6   :  { %v348_v25 = vpop.permute.xlu0 %347 }
 0x1b7   :  { %v355_v26 = vmul.f32 %v348_v25, %v337_v24 }
 0x1b9   :  { %v357_v46 = vsel %vm107_vm0, %v355_v26, 0.0 }
 0x1ba   :  { %v353_v27 = vpop.permute.xlu1 %352  ;;  %358 = vadd.xlane.f32.xlu1 %v357_v46 }
 0x1bb   :  { %v356_v43 = vmul.f32 %v353_v27, %v338_v47 }
 0x1bd   :  { %v360_v28 = vsel %vm107_vm0, %v356_v43, 0.0 }
 0x1be   :  { %361 = vadd.xlane.f32.xlu0 %v360_v28 }
 0x243   :  { %v359_v29 = vpop.xlane.xlu1 %358 }
 0x244   :  { %v364_v30 = vmul.f32 0.0125, %v359_v29 }
 0x246   :  { %v965_v31 = vsub.f32 %v355_v26, %v364_v30  ;;  %v519_v30 = vsub.s32 4, %v841_v1 }
 0x247   :  { %v362_v32 = vpop.xlane.xlu0 %361 }
 0x248   :  { %v365_v33 = vmul.f32 0.0125, %v362_v32  ;;  %v368_v34 = vmul.f32 %v965_v31, %v965_v31 }
 0x24a   :  { %v969_v35 = vsub.f32 %v356_v43, %v365_v33  ;;  %v370_v36 = vsel %vm107_vm0, %v368_v34, 0.0 }
 0x24b   :  { %371 = vadd.xlane.f32.xlu1 %v370_v36 }
 0x24c   :  { %v369_v37 = vmul.f32 %v969_v35, %v969_v35 }
 0x24e   :  { %v373_v38 = vsel %vm107_vm0, %v369_v37, 0.0 }
 0x24f   :  { %374 = vadd.xlane.f32.xlu1 %v373_v38 }
 0x2d4   :  { %v372_v3 = vpop.xlane.xlu1 %371 }
 0x2d5   :  { %v376_v4 = vmul.f32 0.0125, %v372_v3  ;;  %v554_v3 = vrot.slane %v844_v5, %v553_v0 }
 0x2d7   :  { %v378_v6 = vadd.f32 1e-05, %v376_v4 }
 0x2d8   :  { %v375_v7 = vpop.xlane.xlu1 %374 }
 0x2d9   :  { %644 = vrsqrt.f32 %v378_v6  ;;  %v377_v8 = vmul.f32 0.0125, %v375_v7  ;;  %v560_v7 = vrot.slane %v844_v5, %v559_v2 }
 0x2db   :  { %v379_v9 = vadd.f32 1e-05, %v377_v8 }
 0x2dd   :  { %646 = vrsqrt.f32 %v379_v9 }
 0x2e6   :  { %v645_v13 = vpop.eup %644 }
 0x2e7   :  { %v382_v14 = vmul.f32 %v645_v13, %v965_v31  ;;  %v520_v31 = vrot.slane %v844_v5, %v519_v30 }
 0x2e9   :  { %v388_v41 = vmul.f32 %v387_v12, %v382_v14 }
 0x2ea   :  { %v647_v18 = vpop.eup %646 }
 0x2eb   :  { %v394_v19 = vadd.f32 %v393_v17, %v388_v41  ;;  %v383_v39 = vmul.f32 %v647_v18, %v969_v35 }
 0x2ed   :  { %590 = vmatmul.mubr.msk.f32.vlgmr.msra.gmra.mxu0 %vm107_vm0, %v394_v19  ;;  %v389_v20 = vmul.f32 %v387_v12, %v383_v39 }
 0x2ef   :  { %v395_v21 = vadd.f32 %v393_v17, %v389_v20 }
 0x2f1   :  { %591 = vmatmul.mubr.msk.f32.vlgmr.msra.gmra.mxu1 %vm107_vm0, %v395_v21 }
 0x3ad   :  { %v488_v23 = vpop.f32.mrf.mxu0 }
 0x3ae   :  { %v503_v24 = vadd.f32 %v502_v22, %v488_v23 }
 0x3af   :  { %v490_v32 = vpop.f32.mrf.mxu0 }
 0x3b0   :  { %v592_v25 = vmul.f32 -1.442695, %v503_v24  ;;  %v521_v33 = vadd.f32 %v520_v31, %v490_v32 }
 0x3b1   :  { %v494_v26 = vpop.f32.mrf.mxu1 }
 0x3b2   :  { %648 = vpow2.f32 %v592_v25  ;;  %v504_v46 = vadd.f32 %v502_v22, %v494_v26 }
 0x3b3   :  { %v496_v35 = vpop.f32.mrf.mxu1 }
 0x3b4   :  { %v593_v47 = vmul.f32 -1.442695, %v504_v46  ;;  %v522_v37 = vadd.f32 %v520_v31, %v496_v35 }
 0x3b6   :  { %650 = vpow2.f32 %v593_v47 }
 0x3bf   :  { %v649_v27 = vpop.eup %648 }
 0x3c0   :  { %v511_v43 = vadd.f32 1.0, %v649_v27 }
 0x3c2   :  { %652 = vrcp.f32 %v511_v43 }
 0x3c3   :  { %v651_v28 = vpop.eup %650 }
 0x3c4   :  { %v512_v29 = vadd.f32 1.0, %v651_v28 }
 0x3c6   :  { %654 = vrcp.f32 %v512_v29 }
 0x3cf   :  { %v653_v34 = vpop.eup %652 }
 0x3d0   :  { %v523_v36 = vmul.f32 %v653_v34, %v521_v33 }
 0x3d2   :  { %v525_v38 = vsel %vm107_vm0, %v523_v36, 0.0 }
 0x3d3   :  { %v655_v42 = vpop.eup %654  ;;  %526 = vadd.xlane.f32.xlu1 %v525_v38 }
 0x3d4   :  { %v524_v44 = vmul.f32 %v655_v42, %v522_v37 }
 0x3d6   :  { %v528_v45 = vsel %vm107_vm0, %v524_v44, 0.0 }
 0x3d7   :  { %529 = vadd.xlane.f32.xlu1 %v528_v45 }
 0x45c   :  { %v527_v48 = vpop.xlane.xlu1 %526 }
 0x45d   :  { %v531_v49 = vmul.f32 0.0125, %v527_v48 }
 0x45f   :  { %v533_v50 = vsub.f32 %v523_v36, %v531_v49 }
 0x460   :  { %v530_v51 = vpop.xlane.xlu1 %529 }
 0x461   :  { %v532_v52 = vmul.f32 0.0125, %v530_v51  ;;  %v535_v53 = vmul.f32 %v533_v50, %v533_v50 }
 0x463   :  { %v534_v54 = vsub.f32 %v524_v44, %v532_v52  ;;  %v537_v55 = vsel %vm107_vm0, %v535_v53, 0.0 }
 0x464   :  { %538 = vadd.xlane.f32.xlu1 %v537_v55 }
 0x465   :  { %v536_v56 = vmul.f32 %v534_v54, %v534_v54 }
 0x467   :  { %v540_v57 = vsel %vm107_vm0, %v536_v56, 0.0 }
 0x468   :  { %541 = vadd.xlane.f32.xlu1 %v540_v57 }
 0x4ed   :  { %v539_v58 = vpop.xlane.xlu1 %538 }
 0x4ee   :  { %v543_v59 = vmul.f32 0.0125, %v539_v58 }
 0x4f0   :  { %v545_v60 = vadd.f32 1e-05, %v543_v59 }
 0x4f1   :  { %v542_v61 = vpop.xlane.xlu1 %541 }
 0x4f2   :  { %656 = vrsqrt.f32 %v545_v60  ;;  %v544_v62 = vmul.f32 0.0125, %v542_v61 }
 0x4f4   :  { %v546_v63 = vadd.f32 1e-05, %v544_v62 }
 0x4f6   :  { %658 = vrsqrt.f32 %v546_v63 }
 0x4ff   :  { %v657_v4 = vpop.eup %656 }
 0x500   :  { %v549_v6 = vmul.f32 %v657_v4, %v533_v50 }
 0x502   :  { %v555_v8 = vmul.f32 %v554_v3, %v549_v6 }
 0x503   :  { %v659_v9 = vpop.eup %658 }
 0x504   :  { %v550_v10 = vmul.f32 %v659_v9, %v534_v54  ;;  %v561_v11 = vadd.f32 %v560_v7, %v555_v8 }
 0x506   :  { %v556_v12 = vmul.f32 %v554_v3, %v550_v10  ;;  %v563_v13 = vadd.f32 %v561_v11, %v847_v15 }
 0x508   :  { %v562_v14 = vadd.f32 %v560_v7, %v556_v12  ;;  %565 = vst.msk [vmem:[#allocation14] sm:$0xff] %vm107_vm0, %v563_v13 }
 0x50a   :  { %v564_v1 = vadd.f32 %v562_v14, %v849_v16 }
 0x50c   :  { %566 = vst.msk [vmem:[#allocation14 + $0x8] sm:$0xff] %vm107_vm0, %v564_v1 }
 0x50d   :  { %759 = shalt.err (!%p756_p10)
}
 0x50e   :  { %578 = dma.vmem_to_hbm [thread:$0]  %s573_s19, 256, %s1010_s5, [#allocation6], %s780_s23, %s780_s23, %s781_s24  }
 0x50f   :  { %776 = dma.done.wait [#allocation6], 256  }
 0x510   :  { %777 = vsyncadd [#allocation6], 4294967040 }
 0x511   :  { %582 = vsyncpa [#allocation5], 1 }
 0x512   :  { %583 = vsyncpa [#allocation10], 1 }
 0x513   :  { %584 = vsyncpa [#allocation13], 1 }
 0x514   :  { %585 = vsyncpa [#allocation6], 1 }
 0x515   :  { %586 = vsyncpa [#allocation7], 1 }

</bundles_post_ra>
